<compile_context>
chip_gen: v7x
topology: tpu7x:2x2x1
jax: 0.10.0
libtpu: 0.0.40
codegen_flags: <defaults>
</compile_context>

<pallas_src>
import math
from functools import partial

import jax
import jax.numpy as jnp
from jax.experimental import pallas as pl
from jax.experimental.pallas import tpu as pltpu

LANE = 128


def _round_up(x, m):
    return ((x + m - 1) // m) * m


def cellstate_t_kernel(c_ref, w_ref, b_ref, e_ref, d_ref, out_ref):
    # ---- decay factor (tiny (tm, G) vector work; LLO interleaves it with MXU) ----
    d = d_ref[...]                                            # (tm, G) one D per packed group
    decay = jnp.log(jnp.float32(math.e) + d)                  # (tm, G)
    inv = pl.reciprocal(decay, approx=False)                  # exact: holds 1e-5 tolerance
    fac_small = inv - 1.0                                     # (tm, G)  == 1/log(e+D) - 1
    # TODO(synk): if production D can approach 0, switch to the cancellation-free
    # form fac = -log1p(D/e) / log(e+D); for D >= 0.1 the direct form is well
    # within the 1e-5 tolerance.
    # Broadcast each group's scalar across its H lanes via a tiny K=G matmul
    # against a 0/1 expansion matrix (MXU has huge slack in this HBM-bound kernel).
    fac = jnp.dot(fac_small, e_ref[...],
                  preferred_element_type=jnp.float32)         # (tm, G*H)

    # ---- Linear + Tanh: block-diag(W^T,...,W^T) applies per-group c @ W^T ----
    c = c_ref[...]                                            # (tm, G*H)
    z = jnp.dot(c, w_ref[...], preferred_element_type=jnp.float32) + b_ref[...]
    c_s = jnp.tanh(z)                                         # EUP

    # ---- fused tail: (c - c_s) + c_s/decay  ==  c + c_s * (1/decay - 1) ----
    out_ref[...] = (c + c_s * fac).astype(out_ref.dtype)


def make_cellstate_t(W, b, *, tile_rows=2048):
    """Build a CellStateT forward for N independent cell updates.

    W: (H, H) f32 PyTorch Linear weight (out x in), b: (H,) f32 bias.
    Returns apply(c, D) with c: (N, H) f32, D: (N,) or (N, 1) f32, giving
    (N, H) f32 c_hat = (c - tanh(cW^T+b)) + tanh(cW^T+b)/log(e+D).

    Parameter packing (kron block-diagonal W^T, tiled bias, group-expansion
    matrix) is done ONCE here and closed over by `apply`.
    """
    H = W.shape[0]
    dtype = W.dtype

    # Pack G = 128 // H independent rows along the lane axis (lane-dense tiles).
    G = LANE // H if (H < LANE and LANE % H == 0) else 1
    P = G * H                                                # packed lane width

    eye = jnp.eye(G, dtype=dtype)
    w_p = jnp.kron(eye, W.T.astype(dtype))                   # (P, P) block-diag of W^T
    b_p = jnp.tile(b.reshape(1, H).astype(dtype), (1, G))    # (1, P)
    e_p = jnp.kron(eye, jnp.ones((1, H), dtype=dtype))       # (G, P) 0/1 expansion

    @jax.jit
    def apply(c, D):
        N = c.shape[0]
        d = D.reshape(N).astype(c.dtype)

        Np = pl.cdiv(N, G)                                   # packed rows
        # Tile size: as big as possible (HBM-bound; per-step overhead ~0.35 us),
        # but keep >= 2 grid steps so v7x megacore can shard, and cap at
        # `tile_rows` (2048 -> ~6 MiB streamed VMEM incl. double buffering,
        # safe under v5e's 16 MiB default scoped limit).
        half = _round_up(pl.cdiv(Np, 2), 8)
        tm = max(8, min(_round_up(tile_rows, 8), half))
        Np_pad = _round_up(Np, tm)
        N_pad = Np_pad * G
        pad = N_pad - N

        c_pad = jnp.pad(c, ((0, pad), (0, 0)))
        d_pad = jnp.pad(d, (0, pad), constant_values=1.0)    # benign decay for pad rows

        c_p = c_pad.reshape(Np_pad, P)                       # (Np_pad, G*H)
        d_p = d_pad.reshape(Np_pad, G)                       # (Np_pad, G)

        grid = (Np_pad // tm,)

        out_p = pl.pallas_call(
            cellstate_t_kernel,
            out_shape=jax.ShapeDtypeStruct((Np_pad, P), c.dtype),
            grid=grid,
            in_specs=[
                pl.BlockSpec((tm, P), lambda i: (i, 0)),     # c : streams per step
                pl.BlockSpec((P, P), lambda i: (0, 0)),      # W : resident (fetched once)
                pl.BlockSpec((1, P), lambda i: (0, 0)),      # b : resident
                pl.BlockSpec((G, P), lambda i: (0, 0)),      # E : resident
                pl.BlockSpec((tm, G), lambda i: (i, 0)),     # D : streams per step
            ],
            out_specs=pl.BlockSpec((tm, P), lambda i: (i, 0)),
            compiler_params=pltpu.CompilerParams(
                dimension_semantics=("parallel",)),          # independent tiles (megacore)
        )(c_p, w_p, b_p, e_p, d_p)

        return out_p.reshape(N_pad, H)[:N]

    return apply


if __name__ == "__main__":
    hidden_size = 32
    batch = 8
    seq_len = 64                      # many independent cell updates batched per call
    n_updates = batch * seq_len       # 512 rows -> 128 packed rows -> grid=(2,)

    key = jax.random.PRNGKey(0)
    k_c, k_d, k_w, k_b = jax.random.split(key, 4)

    c = jax.random.normal(k_c, (n_updates, hidden_size), dtype=jnp.float32)
    D = jax.random.uniform(k_d, (n_updates, 1), dtype=jnp.float32,
                           minval=0.1, maxval=5.0)

    # Deterministic nn.Linear-style init: U(-1/sqrt(H), 1/sqrt(H))
    bound = 1.0 / math.sqrt(hidden_size)
    W = jax.random.uniform(k_w, (hidden_size, hidden_size), dtype=jnp.float32,
                           minval=-bound, maxval=bound)      # PyTorch weight (out, in)
    b = jax.random.uniform(k_b, (hidden_size,), dtype=jnp.float32,
                           minval=-bound, maxval=bound)

    cellstate_t = make_cellstate_t(W, b)      # one-time parameter packing
    out = cellstate_t(c, D)
    jax.block_until_ready(out)

    # Pure-JAX reference, exact PyTorch forward semantics.
    c_s = jnp.tanh(c @ W.T + b)
    c_l = c - c_s
    ref = c_l + c_s / jnp.log(jnp.float32(math.e) + D)

    assert out.shape == ref.shape
    assert jnp.allclose(out, ref, atol=1e-5, rtol=1e-5), "mismatch vs reference"

    print("KERNEL_OK")
</pallas_src>

<mosaic_0001>
module attributes {stable_mosaic.version = 11 : i64} {
  func.func @cellstate_t_kernel(%arg0: i32, %arg1: memref<64x128xf32, #tpu.memory_space<vmem>>, %arg2: memref<128x128xf32, #tpu.memory_space<vmem>>, %arg3: memref<1x128xf32, #tpu.memory_space<vmem>>, %arg4: memref<4x128xf32, #tpu.memory_space<vmem>>, %arg5: memref<64x4xf32, #tpu.memory_space<vmem>>, %arg6: memref<64x128xf32, #tpu.memory_space<vmem>>) attributes {dimension_semantics = [#tpu.dimension_semantics<parallel>], iteration_bounds = array<i64: 2>, scalar_prefetch = 0 : i64, scratch_operands = 0 : i64, tpu.core_type = #tpu.core_type<tc>, window_params = [{transform_indices = @transform_0, window_bounds = array<i64: 64, 128>}, {pipeline_mode = #tpu.pipeline_mode<synchronous>, transform_indices = @transform_1, window_bounds = array<i64: 128, 128>}, {pipeline_mode = #tpu.pipeline_mode<synchronous>, transform_indices = @transform_2, window_bounds = array<i64: 1, 128>}, {pipeline_mode = #tpu.pipeline_mode<synchronous>, transform_indices = @transform_3, window_bounds = array<i64: 4, 128>}, {transform_indices = @transform_4, window_bounds = array<i64: 64, 4>}, {transform_indices = @transform_5, window_bounds = array<i64: 64, 128>}]} {
    %c0 = arith.constant 0 : index
    %c0_0 = arith.constant 0 : index
    %0 = vector.load %arg5[%c0, %c0_0] : memref<64x4xf32, #tpu.memory_space<vmem>>, vector<64x4xf32>
    %cst = arith.constant 2.71828175 : f32
    %1 = vector.broadcast %cst : f32 to vector<64x4xf32>
    %2 = arith.addf %1, %0 : vector<64x4xf32>
    %3 = math.log %2 : vector<64x4xf32>
    %4 = tpu.reciprocal %3 : vector<64x4xf32> -> vector<64x4xf32>
    %cst_1 = arith.constant 1.000000e+00 : f32
    %5 = vector.broadcast %cst_1 : f32 to vector<64x4xf32>
    %6 = arith.subf %4, %5 : vector<64x4xf32>
    %c0_2 = arith.constant 0 : index
    %c0_3 = arith.constant 0 : index
    %7 = vector.load %arg4[%c0_2, %c0_3] : memref<4x128xf32, #tpu.memory_space<vmem>>, vector<4x128xf32>
    %cst_4 = arith.constant dense<0.000000e+00> : vector<64x128xf32>
    %8 = tpu.matmul %6, %7, %cst_4 {dimension_numbers = #tpu.dot_dimension_numbers<[1], [0], [0], [1], [0, 0, 1, 1], [], []>} : vector<64x4xf32>, vector<4x128xf32>, vector<64x128xf32> -> vector<64x128xf32>
    %c0_5 = arith.constant 0 : index
    %c0_6 = arith.constant 0 : index
    %9 = vector.load %arg1[%c0_5, %c0_6] : memref<64x128xf32, #tpu.memory_space<vmem>>, vector<64x128xf32>
    %c0_7 = arith.constant 0 : index
    %c0_8 = arith.constant 0 : index
    %10 = vector.load %arg2[%c0_7, %c0_8] : memref<128x128xf32, #tpu.memory_space<vmem>>, vector<128x128xf32>
    %cst_9 = arith.constant dense<0.000000e+00> : vector<64x128xf32>
    %11 = tpu.matmul %9, %10, %cst_9 {dimension_numbers = #tpu.dot_dimension_numbers<[1], [0], [0], [1], [0, 0, 1, 1], [], []>} : vector<64x128xf32>, vector<128x128xf32>, vector<64x128xf32> -> vector<64x128xf32>
    %c0_10 = arith.constant 0 : index
    %c0_11 = arith.constant 0 : index
    %12 = vector.load %arg3[%c0_10, %c0_11] : memref<1x128xf32, #tpu.memory_space<vmem>>, vector<1x128xf32>
    %13 = vector.broadcast %12 : vector<1x128xf32> to vector<64x128xf32>
    %14 = arith.addf %11, %13 : vector<64x128xf32>
    %15 = math.tanh %14 : vector<64x128xf32>
    %16 = arith.mulf %15, %8 : vector<64x128xf32>
    %17 = arith.addf %9, %16 : vector<64x128xf32>
    %c0_12 = arith.constant 0 : index
    %c0_13 = arith.constant 0 : index
    %18 = vector.load %arg6[%c0_12, %c0_13] : memref<64x128xf32, #tpu.memory_space<vmem>>, vector<64x128xf32>
    tpu.vector_store %arg6[%c0_12, %c0_13], %17 {strides = array<i32>} : memref<64x128xf32, #tpu.memory_space<vmem>>, vector<64x128xf32>,
    return
  }
  func.func @transform_0(%arg0: i32) -> (i32, i32) {
    %c0_i32 = arith.constant 0 : i32
    %c0_i32_0 = arith.constant 0 : i32
    return %arg0, %c0_i32 : i32, i32
  }
  func.func @transform_1(%arg0: i32) -> (i32, i32) {
    %c0_i32 = arith.constant 0 : i32
    %c0_i32_0 = arith.constant 0 : i32
    %c0_i32_1 = arith.constant 0 : i32
    return %c0_i32, %c0_i32_0 : i32, i32
  }
  func.func @transform_2(%arg0: i32) -> (i32, i32) {
    %c0_i32 = arith.constant 0 : i32
    %c0_i32_0 = arith.constant 0 : i32
    %c0_i32_1 = arith.constant 0 : i32
    return %c0_i32, %c0_i32_0 : i32, i32
  }
  func.func @transform_3(%arg0: i32) -> (i32, i32) {
    %c0_i32 = arith.constant 0 : i32
    %c0_i32_0 = arith.constant 0 : i32
    %c0_i32_1 = arith.constant 0 : i32
    return %c0_i32, %c0_i32_0 : i32, i32
  }
  func.func @transform_4(%arg0: i32) -> (i32, i32) {
    %c0_i32 = arith.constant 0 : i32
    %c0_i32_0 = arith.constant 0 : i32
    return %arg0, %c0_i32 : i32, i32
  }
  func.func @transform_5(%arg0: i32) -> (i32, i32) {
    %c0_i32 = arith.constant 0 : i32
    %c0_i32_0 = arith.constant 0 : i32
    return %arg0, %c0_i32 : i32, i32
  }
}

</mosaic_0001>

<bundles_post_ra>
// kernel: apply.1
= control target key start
LH: loop header
LB: loop body
LE: loop exit
PB: predicated region body
PF: predicated region fallthrough
CT: control target
= control target key end

     0   :  { %s933_s18 = smov 0   ;;  %s1120_s0 = inlined_call_operand.vmem [shape: f32[128,128], index: 0, kind: input, shape index: {}]   ;;  %s1121_s1 = inlined_call_operand.vmem [shape: f32[128,128], index: 1, kind: input, shape index: {}]   ;;  %s1122_s2 = inlined_call_operand.vmem [shape: f32[1,128], index: 2, kind: input, shape index: {}]   ;;  %s1123_s3 = inlined_call_operand.vmem [shape: f32[4,128], index: 3, kind: input, shape index: {}]   ;;  %s1124_s4 = inlined_call_operand.vmem [shape: f32[128,4], index: 4, kind: input, shape index: {}]   ;;  %s1125_s5 = inlined_call_operand.vmem [shape: f32[128,128], index: 5, kind: output, shape index: {}]  }
   0x1 LB: > { %s669_s19 = sadd.s32 4294967295, %s901_s18   ;;  %p673_p0 = scmp.ge.s32.totalorder %s901_s18, 1  ;;  %s901_s18 = sphi %s933_s18, %s15_s18  }
   0x2   : > { %p199_p1 = scmp.lt.s32.totalorder %s901_s18, 3 }
   0x4   : > { %p200_p2 = pnand %p673_p0, %p199_p1 }
   0x5   : > { %v441_v0 = vld [vmem:[%s1121_s1] sm:$0xff] (!%p200_p2)  ;;  %v442_v1 = vld [vmem:[%s1121_s1 + $0x8] sm:$0xff] (!%p200_p2)  ;;  %v443_v2 = vld [vmem:[%s1121_s1 + $0x10] sm:$0xff] (!%p200_p2)  ;;  %s674_s26 = sshll.u32 (!%p200_p2), %s669_s19, 3  ;;  %vm324_vm0 = vcmask (!%p200_p2), 1043456   ;;  %vm299_vm1 = vcmask (!%p200_p2), 31744  }
   0x6   : > { %203 = sbr.rel (%p200_p2) target bundleno = 309 (0x135), region = 40  ;;  %v950_v3 = vpack.c.bf16 (!%p200_p2), %v442_v1, %v441_v0  ;;  %v444_v4 = vld [vmem:[%s1121_s1 + $0x18] sm:$0xff] (!%p200_p2)  ;;  %p233_p3 = scmp.lt.s32.totalorder (!%p200_p2), %s674_s26, 15  ;;  %v445_v6 = vld [vmem:[%s1121_s1 + $0x20] sm:$0xff] (!%p200_p2)  ;;  %v446_v7 = vld [vmem:[%s1121_s1 + $0x28] sm:$0xff] (!%p200_p2) }
   0x7   : > { %v955_v5 = vpack.c.bf16 (!%p200_p2), %v444_v4, %v443_v2  ;;  %v298_v8 = vld [vmem:[%s1123_s3] sm:$0xf] (!%p200_p2)  ;;  %v969_v9 = vpack.c.bf16 (!%p200_p2), %v446_v7, %v445_v6  ;;  %v447_v10 = vld [vmem:[%s1121_s1 + $0x30] sm:$0xff] (!%p200_p2)  ;;  %v448_v11 = vld [vmem:[%s1121_s1 + $0x38] sm:$0xff] (!%p200_p2) }
   0x8   : > { %823 = vmatprep.subr.bf16.mxu1 (!%p200_p2), %v950_v3  ;;  %733 = vmatprep.subr.msk.mxu0 (!%p200_p2), %vm324_vm0, %v298_v8  ;;  %v996_v17 = vpack.c.bf16 (!%p200_p2), %v448_v11, %v447_v10  ;;  %v449_v18 = vld [vmem:[%s1121_s1 + $0x40] sm:$0xff] (!%p200_p2)  ;;  %v450_v19 = vld [vmem:[%s1121_s1 + $0x48] sm:$0xff] (!%p200_p2)  ;;  %v451_v32 = vld [vmem:[%s1121_s1 + $0x50] sm:$0xff] (!%p200_p2) }
   0x9   : > { %831 = vmatpush3.bf16.msra.mxu1 (!%p200_p2), %v950_v3  ;;  %734 = vmatpush3.msk.msra.mxu0 (!%p200_p2), %vm324_vm0, %v298_v8  ;;  %v1006_v29 = vpack.c.bf16 (!%p200_p2), %v450_v19, %v449_v18  ;;  %v452_v33 = vld [vmem:[%s1121_s1 + $0x58] sm:$0xff] (!%p200_p2)  ;;  %v453_v36 = vld [vmem:[%s1121_s1 + $0x60] sm:$0xff] (!%p200_p2)  ;;  %v454_v37 = vld [vmem:[%s1121_s1 + $0x68] sm:$0xff] (!%p200_p2) }
   0xa   : > { %824 = vmatprep.subr.bf16.mxu1 (!%p200_p2), %v955_v5  ;;  %792 = vmatprep.subr.bf16.mxu0 (!%p200_p2), %v950_v3  ;;  %v1016_v35 = vpack.c.bf16 (!%p200_p2), %v452_v33, %v451_v32  ;;  %v1026_v40 = vpack.c.bf16 (!%p200_p2), %v454_v37, %v453_v36  ;;  %v455_v43 = vld [vmem:[%s1121_s1 + $0x70] sm:$0xff] (!%p200_p2)  ;;  %v456_v44 = vld [vmem:[%s1121_s1 + $0x78] sm:$0xff] (!%p200_p2) }
   0xb   : > { %v1036_v49 = vpack.c.bf16 (!%p200_p2), %v456_v44, %v455_v43 }
   0xd   : > { %s1127_s26 = smov (!%p233_p3, %s674_s26), 15  ;;  %832 = vmatpush3.bf16.msra.mxu1 %v955_v5 }
   0xe   : > { %s971_s10 = sshll.u32 %s1127_s26, 3  ;;  %825 = vmatprep.subr.bf16.mxu1 %v969_v9 }
   0xf   : > { %s242_s17 = scalar_lea.vmem %s1124_s4, %s971_s10  ;;  %s987_s21 = scalar_lea.vmem %s1120_s0, %s971_s10 }
  0x10   : > { %v250_v12 = vld [vmem:[%s242_s17] sm:$0xff]  ;;  %v251_v13 = vld [vmem:[%s242_s17 + $0x8] sm:$0xff]  ;;  %v991_v14 = vld [vmem:[%s987_s21 + $0x10] sm:$0xff]  ;;  %s1099_s19 = scalar_lea.vmem %s1125_s5, %s971_s10 }
  0x11   : > { %v258_v15 = vadd.f32 2.7182817, %v250_v12  ;;  %v259_v16 = vadd.f32 2.7182817, %v251_v13  ;;  %782 = vmatprep.mubr.f32.mxu1 %v991_v14  ;;  %v252_v20 = vld [vmem:[%s242_s17 + $0x10] sm:$0xff]  ;;  %v253_v21 = vld [vmem:[%s242_s17 + $0x18] sm:$0xff]  ;;  %833 = vmatpush3.bf16.msra.mxu1 %v969_v9 }
  0x12   : > { %v254_v22 = vld [vmem:[%s242_s17 + $0x20] sm:$0xff]  ;;  %v260_v23 = vadd.f32 2.7182817, %v252_v20  ;;  %v261_v24 = vadd.f32 2.7182817, %v253_v21  ;;  %v255_v26 = vld [vmem:[%s242_s17 + $0x28] sm:$0xff]  ;;  %826 = vmatprep.subr.bf16.mxu1 %v996_v17 }
  0x13   : > { %847 = vlog2.f32 %v258_v15  ;;  %v262_v25 = vadd.f32 2.7182817, %v254_v22  ;;  %v256_v27 = vld [vmem:[%s242_s17 + $0x30] sm:$0xff]  ;;  %v257_v28 = vld [vmem:[%s242_s17 + $0x38] sm:$0xff]  ;;  %v263_v30 = vadd.f32 2.7182817, %v255_v26 }
  0x14   : > { %849 = vlog2.f32 %v259_v16  ;;  %v264_v31 = vadd.f32 2.7182817, %v256_v27  ;;  %v265_v34 = vadd.f32 2.7182817, %v257_v28  ;;  %v1042_v58 = vld [vmem:[%s987_s21 + $0x18] sm:$0xff]  ;;  %v1045_v60 = vld [vmem:[%s987_s21 + $0x20] sm:$0xff] }
  0x15   : > { %851 = vlog2.f32 %v260_v23  ;;  %834 = vmatpush3.bf16.msra.mxu1 %v996_v17  ;;  %v1051_v1 = vld [vmem:[%s987_s21 + $0x28] sm:$0xff]  ;;  %v1055_v4 = vld [vmem:[%s987_s21 + $0x30] sm:$0xff]  ;;  %v1062_v13 = vld [vmem:[%s987_s21 + $0x38] sm:$0xff] }
  0x16   : > { %853 = vlog2.f32 %v261_v24  ;;  %827 = vmatprep.subr.bf16.mxu1 %v1006_v29  ;;  %v1075_v19 = vld [vmem:[%s987_s21] sm:$0xff] }
  0x17   : > { %855 = vlog2.f32 %v262_v25 }
  0x18   : > { %857 = vlog2.f32 %v263_v30 }
  0x19   : > { %859 = vlog2.f32 %v264_v31  ;;  %835 = vmatpush3.bf16.msra.mxu1 %v1006_v29 }
  0x1a   : > { %861 = vlog2.f32 %v265_v34  ;;  %828 = vmatprep.subr.bf16.mxu1 %v1016_v35 }
  0x1d   : > { %v848_v38 = vpop.eup %847  ;;  %836 = vmatpush3.bf16.msra.mxu1 %v1016_v35 }
  0x1e   : > { %v850_v39 = vpop.eup %849  ;;  %v267_v41 = vmul.f32 0.6931472, %v848_v38  ;;  %829 = vmatprep.subr.bf16.mxu1 %v1026_v40 }
  0x1f   : > { %v269_v42 = vmul.f32 0.6931472, %v850_v39  ;;  %v852_v45 = vpop.eup %851 }
  0x20   : > { %863 = vrcp.f32 %v267_v41  ;;  %v854_v46 = vpop.eup %853  ;;  %v271_v47 = vmul.f32 0.6931472, %v852_v45 }
  0x21   : > { %865 = vrcp.f32 %v269_v42  ;;  %v856_v48 = vpop.eup %855  ;;  %v273_v50 = vmul.f32 0.6931472, %v854_v46  ;;  %837 = vmatpush3.bf16.msra.mxu1 %v1026_v40 }
  0x22   : > { %v858_v51 = vpop.eup %857  ;;  %867 = vrcp.f32 %v271_v47  ;;  %v275_v52 = vmul.f32 0.6931472, %v856_v48  ;;  %830 = vmatprep.subr.bf16.mxu1 %v1036_v49 }
  0x23   : > { %v860_v53 = vpop.eup %859  ;;  %869 = vrcp.f32 %v273_v50  ;;  %v277_v54 = vmul.f32 0.6931472, %v858_v51 }
  0x24   : > { %v862_v55 = vpop.eup %861  ;;  %871 = vrcp.f32 %v275_v52  ;;  %v279_v56 = vmul.f32 0.6931472, %v860_v53 }
  0x25   : > { %873 = vrcp.f32 %v277_v54  ;;  %v281_v57 = vmul.f32 0.6931472, %v862_v55  ;;  %838 = vmatpush3.bf16.msra.mxu1 %v1036_v49 }
  0x26   : > { %875 = vrcp.f32 %v279_v56 }
  0x27   : > { %877 = vrcp.f32 %v281_v57 }
  0x28   : > { %783 = vmatmul.mubr.f32.vlgmr.msra.gmra.mrb[0].mxu1 %v1042_v58 }
  0x29   : > { %785 = vmatprep.mubr.f32.mxu1 %v1045_v60 }
  0x2a   : > { %v864_v59 = vpop.eup %863 }
  0x2b   : > { %v866_v61 = vpop.eup %865  ;;  %v680_v62 = vadd.f32 -1.0, %v864_v59 }
  0x2c   : > { %v681_v63 = vadd.f32 -1.0, %v866_v61  ;;  %v868_v0 = vpop.eup %867  ;;  %786 = vmatmul.mubr.f32.gmra.mrb[2].mxu1 %v1051_v1 }
  0x2d   : > { %735 = vmatprep.mubr.msk.f32.mxu0 %vm299_vm1, %v680_v62  ;;  %v870_v2 = vpop.eup %869  ;;  %v682_v6 = vadd.f32 -1.0, %v868_v0  ;;  %788 = vmatprep.mubr.f32.mxu1 %v1055_v4 }
  0x2e   : > { %736 = vmatmul.mubr.msk.f32.vlgmr.msra.gmra.mrb[0].mxu0 %vm299_vm1, %v681_v63  ;;  %v872_v7 = vpop.eup %871  ;;  %v683_v8 = vadd.f32 -1.0, %v870_v2 }
  0x2f   : > { %794 = vmatpush3.bf16.msra.mxu0 %v950_v3  ;;  %v874_v10 = vpop.eup %873  ;;  %v684_v11 = vadd.f32 -1.0, %v872_v7  ;;  %738 = vmatprep.mubr.msk.f32.mxu0 %vm299_vm1, %v682_v6 }
  0x30   : > { %796 = vmatprep.subr.bf16.mxu0 %v955_v5  ;;  %v876_v12 = vpop.eup %875  ;;  %v685_v15 = vadd.f32 -1.0, %v874_v10  ;;  %789 = vmatmul.mubr.f32.gmra.mrb[4].mxu1 %v1062_v13 }
  0x31   : > { %v878_v16 = vpop.eup %877  ;;  %v686_v3 = vadd.f32 -1.0, %v876_v12 }
  0x32   : > { %739 = vmatmul.mubr.msk.f32.gmra.mrb[2].mxu0 %vm299_vm1, %v683_v8  ;;  %v687_v18 = vadd.f32 -1.0, %v878_v16 }
  0x33   : > { %798 = vmatpush3.bf16.msra.mxu0 %v955_v5  ;;  %741 = vmatprep.mubr.msk.f32.mxu0 %vm299_vm1, %v684_v11  ;;  %v1089_v5 = vld [vmem:[%s987_s21 + $0x8] sm:$0xff] }
  0x34   : > { %800 = vmatprep.subr.bf16.mxu0 %v969_v9 }
  0x36   : > { %742 = vmatmul.mubr.msk.f32.gmra.mrb[4].mxu0 %vm299_vm1, %v685_v15 }
  0x37   : > { %802 = vmatpush3.bf16.msra.mxu0 %v969_v9  ;;  %744 = vmatprep.mubr.msk.f32.mxu0 %vm299_vm1, %v686_v3  ;;  %v697_v9 = vld [vmem:[%s1122_s2] ss:$0 sm:$0xff] }
  0x38   : > { %804 = vmatprep.subr.bf16.mxu0 %v996_v17 }
  0x3a   : > { %745 = vmatmul.mubr.msk.f32.gmra.mrb[6].mxu0 %vm299_vm1, %v687_v18 }
  0x3b   : > { %806 = vmatpush3.bf16.msra.mxu0 %v996_v17  ;;  %779 = vmatprep.mubr.f32.mxu0 %v1075_v19 }
  0x3c   : > { %808 = vmatprep.subr.bf16.mxu0 %v1006_v29 }
  0x3f   : > { %810 = vmatpush3.bf16.msra.mxu0 %v1006_v29 }
  0x40   : > { %812 = vmatprep.subr.bf16.mxu0 %v1016_v35 }
  0x43   : > { %814 = vmatpush3.bf16.msra.mxu0 %v1016_v35 }
  0x44   : > { %816 = vmatprep.subr.bf16.mxu0 %v1026_v40 }
  0x47   : > { %818 = vmatpush3.bf16.msra.mxu0 %v1026_v40 }
  0x48   : > { %820 = vmatprep.subr.bf16.mxu0 %v1036_v49 }
  0x4b   : > { %822 = vmatpush3.bf16.msra.mxu0 %v1036_v49 }
  0x4e   : > { %780 = vmatmul.mubr.f32.vlgmr.msra.gmra.mrb[8].mxu0 %v1089_v5 }
  0xfb   : > { %v784_v17 = vpop.f32.mrb[0].mxu1 }
  0xfc   : > { %v546_v20 = vadd.f32 %v784_v17, %v697_v9  ;;  %v540_v21 = vpop.f32.mrb[1].mxu1 }
  0xfd   : > { %v541_v23 = vadd.f32 %v697_v9, %v540_v21 }
  0xfe   : > { %879 = vtanh.f32 %v546_v20 }
  0xff   : > { %881 = vtanh.f32 %v541_v23  ;;  %v787_v25 = vpop.f32.mrb[2].mxu1 }
 0x100   : > { %v556_v26 = vadd.f32 %v787_v25, %v697_v9  ;;  %v550_v27 = vpop.f32.mrb[3].mxu1 }
 0x101   : > { %v737_v22 = vpop.f32.mrb[0].mxu0  ;;  %v551_v28 = vadd.f32 %v697_v9, %v550_v27 }
 0x102   : > { %v394_v24 = vpop.f32.mrb[1].mxu0  ;;  %883 = vtanh.f32 %v556_v26 }
 0x103   : > { %885 = vtanh.f32 %v551_v28  ;;  %v790_v31 = vpop.f32.mrb[4].mxu1 }
 0x104   : > { %v566_v32 = vadd.f32 %v790_v31, %v697_v9  ;;  %v560_v33 = vpop.f32.mrb[5].mxu1 }
 0x105   : > { %v740_v29 = vpop.f32.mrb[2].mxu0  ;;  %v561_v34 = vadd.f32 %v697_v9, %v560_v33 }
 0x106   : > { %v404_v30 = vpop.f32.mrb[3].mxu0  ;;  %887 = vtanh.f32 %v566_v32 }
 0x107   : > { %889 = vtanh.f32 %v561_v34 }
 0x108   : > { %v880_v37 = vpop.eup %879 }
 0x109   : > { %v743_v35 = vpop.f32.mrb[4].mxu0  ;;  %v882_v38 = vpop.eup %881  ;;  %v580_v39 = vmul.f32 %v880_v37, %v740_v29 }
 0x10a   : > { %v414_v36 = vpop.f32.mrb[5].mxu0  ;;  %v579_v41 = vmul.f32 %v882_v38, %v404_v30 }
 0x10b   : > { %v588_v43 = vadd.f32 %v580_v39, %v1042_v58 }
 0x10c   : > { %v884_v44 = vpop.eup %883  ;;  %v587_v45 = vadd.f32 %v579_v41, %v991_v14 }
 0x10d   : > { %v746_v40 = vpop.f32.mrb[6].mxu0  ;;  %v886_v46 = vpop.eup %885  ;;  %596 = vst [vmem:[%s1099_s19 + $0x18] sm:$0xff] %v588_v43  ;;  %v582_v47 = vmul.f32 %v884_v44, %v743_v35 }
 0x10e   : > { %v424_v42 = vpop.f32.mrb[7].mxu0  ;;  %595 = vst [vmem:[%s1099_s19 + $0x10] sm:$0xff] %v587_v45  ;;  %v581_v48 = vmul.f32 %v886_v46, %v414_v36 }
 0x10f   : > { %v590_v49 = vadd.f32 %v582_v47, %v1051_v1 }
 0x110   : > { %v888_v50 = vpop.eup %887  ;;  %v589_v51 = vadd.f32 %v581_v48, %v1045_v60 }
 0x111   : > { %v890_v52 = vpop.eup %889  ;;  %598 = vst [vmem:[%s1099_s19 + $0x28] sm:$0xff] %v590_v49  ;;  %v584_v53 = vmul.f32 %v888_v50, %v746_v40 }
 0x112   : > { %597 = vst [vmem:[%s1099_s19 + $0x20] sm:$0xff] %v589_v51  ;;  %v583_v54 = vmul.f32 %v890_v52, %v424_v42 }
 0x113   : > { %v592_v55 = vadd.f32 %v584_v53, %v1062_v13 }
 0x114   : > { %v591_v14 = vadd.f32 %v583_v54, %v1055_v4 }
 0x115   : > { %600 = vst [vmem:[%s1099_s19 + $0x38] sm:$0xff] %v592_v55 }
 0x116   : > { %599 = vst [vmem:[%s1099_s19 + $0x30] sm:$0xff] %v591_v14 }
 0x121   : > { %v781_v56 = vpop.f32.mrb[8].mxu0 }
 0x122   : > { %v536_v57 = vadd.f32 %v781_v56, %v697_v9  ;;  %v530_v58 = vpop.f32.mrb[9].mxu0 }
 0x123   : > { %v531_v59 = vadd.f32 %v697_v9, %v530_v58 }
 0x124   : > { %891 = vtanh.f32 %v536_v57 }
 0x125   : > { %893 = vtanh.f32 %v531_v59 }
 0x12e   : > { %v892_v60 = vpop.eup %891 }
 0x12f   : > { %v894_v61 = vpop.eup %893  ;;  %v578_v62 = vmul.f32 %v892_v60, %v737_v22 }
 0x130   : > { %v577_v63 = vmul.f32 %v894_v61, %v394_v24 }
 0x131   : > { %v586_v0 = vadd.f32 %v578_v62, %v1089_v5 }
 0x132   : > { %v585_v1 = vadd.f32 %v577_v63, %v1075_v19 }
 0x133   : > { %594 = vst [vmem:[%s1099_s19 + $0x8] sm:$0xff] %v586_v0 }
 0x134   : > { %593 = vst [vmem:[%s1099_s19] sm:$0xff] %v585_v1 }
 0x135 PF: > { %s15_s18 = sadd.s32 1, %s901_s18  }
 0x136   : > { %p12_p4 = scmp.ge.s32.totalorder %s15_s18, 4  }
 0x138   :  { %14 = sbr.rel (!%p12_p4) target bundleno = 1 (0x1), region = 73 }

</bundles_post_ra>
